<compile_context>
chip_gen: v6e
topology: v6e:2x2x1
jax: 0.10.0
libtpu: 0.0.40
codegen_flags: <defaults>
</compile_context>

<pallas_src>
import functools

import jax
import jax.numpy as jnp
from jax.experimental import pallas as pl
from jax.experimental.pallas import tpu as pltpu


def _round_up(x, m):
    return (x + m - 1) // m * m


def gate_kernel(x_ref, w1_ref, w2_ref, b2_ref, gamma_ref, beta_ref, o_ref,
                sum_ref, sumsq_ref, c_ref, scale_ref, shift_ref, *opt_scratch,
                inv_n, n_rows, tile_n, needs_mask, stash, matmul_dtype):
    """grid = (phase, batch-tile). phase 0: batch statistics; phase 1: apply."""
    h_ref = opt_scratch[0] if stash else None
    phase = pl.program_id(0)
    tile = pl.program_id(1)

    def valid_rows():
        rows = tile * tile_n + jax.lax.broadcasted_iota(jnp.int32, (tile_n, 1), 0)
        return rows < n_rows

    @pl.when(phase == 0)
    def _stats():
        @pl.when(tile == 0)
        def _init():
            sum_ref[...] = jnp.zeros_like(sum_ref)
            sumsq_ref[...] = jnp.zeros_like(sumsq_ref)

        # linear1 (b1 omitted: it is cancelled exactly by the BN mean subtraction).
        h = jnp.dot(x_ref[...].astype(matmul_dtype), w1_ref[...],
                    preferred_element_type=jnp.float32)
        if needs_mask:
            # Ragged last tile: rows >= N hold unspecified data; select-zero them
            # (where, not *mask, so a stray NaN/Inf cannot leak into the stats).
            h = jnp.where(valid_rows(), h, 0.0)

        s = jnp.sum(h, axis=0, keepdims=True)

        @pl.when(tile == 0)
        def _set_offset():
            # Per-feature offset c ~= batch mean (any constant is exact):
            # conditions var = E[(h-c)^2] - (E[h]-c)^2 against cancellation.
            c_ref[...] = s * (1.0 / tile_n)

        sum_ref[...] += s
        d = h - c_ref[...]
        if needs_mask:
            d = jnp.where(valid_rows(), d, 0.0)
        sumsq_ref[...] += jnp.sum(d * d, axis=0, keepdims=True)

        if stash:
            # Keep h resident in VMEM so phase 1 skips the x re-read and the
            # underfilled (K=32) linear1 recompute.
            h_ref[tile] = h.astype(h_ref.dtype)

    @pl.when(phase == 1)
    def _apply():
        @pl.when(tile == 0)
        def _fold_bn():
            # Fold BN into one scale/shift: scale = gamma * rsqrt(var + eps),
            # shift = beta - mean * scale. rsqrt goes to the EUP (free slot).
            mean = sum_ref[...] * inv_n
            mc = mean - c_ref[...]
            var = jnp.maximum(sumsq_ref[...] * inv_n - mc * mc, 0.0)
            scale = gamma_ref[...] * jax.lax.rsqrt(var + 1e-5)
            scale_ref[...] = scale
            shift_ref[...] = beta_ref[...] - mean * scale

        if stash:
            h = h_ref[tile].astype(jnp.float32)
        else:
            h = jnp.dot(x_ref[...].astype(matmul_dtype), w1_ref[...],
                        preferred_element_type=jnp.float32)
        hn = jnp.maximum(h * scale_ref[...] + shift_ref[...], 0.0)   # BN + ReLU
        out = jnp.dot(hn.astype(matmul_dtype), w2_ref[...],
                      preferred_element_type=jnp.float32)
        o_ref[...] = (out + b2_ref[...]).astype(o_ref.dtype)


def gate_forward_padded(x, w1, b1, w2, b2, gamma, beta, *,
                        tile_n=512, matmul_dtype=jnp.bfloat16,
                        out_dtype=jnp.bfloat16, stash_h=None,
                        stash_limit_bytes=16 * 1024 * 1024):
    """Fused gate forward. Returns an (N, G_pad) slab in out_dtype; columns
    [G:G_pad] are exactly zero. Consumers should fuse the [:, :G] slice."""
    # b1 is mathematically cancelled by the training-mode BN mean subtraction.
    del b1
    N, E = x.shape
    G = w1.shape[1]
    G_pad = _round_up(G, 128)                     # lane-dense feature axis (300 -> 384)

    tile_n = max(8, min(_round_up(tile_n, 8), _round_up(N, 8)))
    nt = pl.cdiv(N, tile_n)
    needs_mask = (N % tile_n) != 0

    if stash_h is None:                           # auto: stash h when it fits VMEM
        stash_h = nt * tile_n * G_pad * 2 <= stash_limit_bytes

    # Weight/param padding is tiny and one-time (zeros in padded columns give
    # scale = shift = 0 in the folded BN, so nothing leaks into real outputs).
    w1_p = jnp.pad(w1, ((0, 0), (0, G_pad - G))).astype(matmul_dtype)
    w2_p = jnp.pad(w2, ((0, G_pad - G), (0, G_pad - G))).astype(matmul_dtype)
    b2_p = jnp.pad(b2.reshape(1, -1), ((0, 0), (0, G_pad - G))).astype(jnp.float32)
    gamma_p = jnp.pad(gamma.reshape(1, -1), ((0, 0), (0, G_pad - G))).astype(jnp.float32)
    beta_p = jnp.pad(beta.reshape(1, -1), ((0, 0), (0, G_pad - G))).astype(jnp.float32)

    kernel = functools.partial(
        gate_kernel, inv_n=1.0 / N, n_rows=N, tile_n=tile_n,
        needs_mask=needs_mask, stash=stash_h, matmul_dtype=matmul_dtype)

    # With the stash, phase 1 never reads x: pin its block index to 0 so the
    # pipeline skips the second x pass entirely.
    x_idx = (lambda p, i: (i * (1 - p), 0)) if stash_h else (lambda p, i: (i, 0))

    scratch_shapes = [pltpu.VMEM((1, G_pad), jnp.float32)] * 5   # sum,sumsq,c,scale,shift
    if stash_h:
        scratch_shapes = scratch_shapes + [pltpu.VMEM((nt, tile_n, G_pad), jnp.bfloat16)]

    n_x_passes = 1 if stash_h else 2
    cost = pl.CostEstimate(
        flops=2 * n_x_passes * N * E * G_pad + 2 * N * G_pad * G_pad,
        transcendentals=G_pad,
        bytes_accessed=(n_x_passes * N * E * jnp.dtype(x.dtype).itemsize
                        + (E * G_pad + G_pad * G_pad) * jnp.dtype(matmul_dtype).itemsize
                        + N * G_pad * jnp.dtype(out_dtype).itemsize
                        + 3 * G_pad * 4),
    )

    grid_spec = pltpu.PrefetchScalarGridSpec(
        num_scalar_prefetch=0,
        # (phase, batch tile): phase leads so every tile finishes the stats pass
        # before the apply pass starts.
        grid=(2, nt),
        in_specs=[
            pl.BlockSpec((tile_n, E), x_idx),                    # x (f32, cast in-kernel)
            pl.BlockSpec((E, G_pad), lambda p, i: (0, 0)),       # w1 (VMEM-resident)
            pl.BlockSpec((G_pad, G_pad), lambda p, i: (0, 0)),   # w2 (VMEM-resident)
            pl.BlockSpec((1, G_pad), lambda p, i: (0, 0)),       # b2
            pl.BlockSpec((1, G_pad), lambda p, i: (0, 0)),       # gamma
            pl.BlockSpec((1, G_pad), lambda p, i: (0, 0)),       # beta
        ],
        # p*i pins the output block at 0 (untouched) through the stats pass; each
        # output block then gets exactly one contiguous visit in the apply pass.
        out_specs=pl.BlockSpec((tile_n, G_pad), lambda p, i: (p * i, 0)),
        scratch_shapes=scratch_shapes,
    )

    out = pl.pallas_call(
        kernel,
        out_shape=jax.ShapeDtypeStruct((N, G_pad), out_dtype),
        grid_spec=grid_spec,
        # Both axes "arbitrary": the batch-stat scratch must see every tile on a
        # single core. (TODO(synk): v7x dual-TC split, see header.)
        compiler_params=pltpu.CompilerParams(
            dimension_semantics=("arbitrary", "arbitrary"),
            vmem_limit_bytes=(32 * 1024 * 1024 if stash_h else None)),
        cost_estimate=cost,
    )(x, w1_p, w2_p, b2_p, gamma_p, beta_p)
    return out


def gate_forward(x, w1, b1, w2, b2, gamma, beta, **kwargs):
    """Module-faithful wrapper returning (N, gate_dim). NOTE: the [:, :G] slice
    is an extra HBM pass; perf-sensitive callers should use gate_forward_padded
    and fuse the slice into the consumer."""
    G = w1.shape[1]
    return gate_forward_padded(x, w1, b1, w2, b2, gamma, beta, **kwargs)[:, :G]


def init_params(key, emb_dim, gate_dim):
    # Deterministic synthetic init (PyTorch-style uniform bounds for Linear).
    k1, k2, k3, k4 = jax.random.split(key, 4)
    bound1 = 1.0 / (emb_dim ** 0.5)
    bound2 = 1.0 / (gate_dim ** 0.5)
    w1 = jax.random.uniform(k1, (emb_dim, gate_dim), jnp.float32, -bound1, bound1)
    b1 = jax.random.uniform(k2, (1, gate_dim), jnp.float32, -bound1, bound1)
    w2 = jax.random.uniform(k3, (gate_dim, gate_dim), jnp.float32, -bound2, bound2)
    b2 = jax.random.uniform(k4, (1, gate_dim), jnp.float32, -bound2, bound2)
    gamma = jnp.ones((1, gate_dim), jnp.float32)   # BatchNorm1d weight
    beta = jnp.zeros((1, gate_dim), jnp.float32)   # BatchNorm1d bias
    return w1, b1, w2, b2, gamma, beta


def reference_forward(x, w1, b1, w2, b2, gamma, beta, *, matmul_dtype=jnp.float32):
    # Pure-JAX reference with matching matmul input dtype.
    h = jnp.dot(x.astype(matmul_dtype), w1.astype(matmul_dtype),
                preferred_element_type=jnp.float32) + b1
    mean = h.mean(axis=0, keepdims=True)
    var = ((h - mean) ** 2).mean(axis=0, keepdims=True)
    h = (h - mean) * jax.lax.rsqrt(var + 1e-5) * gamma + beta
    h = jnp.maximum(h, 0.0)
    return jnp.dot(h.astype(matmul_dtype), w2.astype(matmul_dtype),
                   preferred_element_type=jnp.float32) + b2


if __name__ == "__main__":
    emb_dim, gate_dim = 32, 300            # module default gate_dim=300 -> 384 lane pad
    key = jax.random.PRNGKey(0)
    kx1, kx2, kp = jax.random.split(key, 3)
    params = init_params(kp, emb_dim, gate_dim)

    # Case 1: tiny batch (module-default shapes), single tile, VMEM h stash.
    x_small = jax.random.normal(kx1, (8, emb_dim), jnp.float32)
    out1 = jax.block_until_ready(gate_forward_padded(x_small, *params))
    ref1 = reference_forward(x_small, *params, matmul_dtype=jnp.bfloat16)
    assert out1.shape == (8, 384) and out1.dtype == jnp.bfloat16
    assert jnp.allclose(out1[:, :gate_dim].astype(jnp.float32), ref1,
                        atol=2e-2, rtol=2e-2), "case 1 mismatch vs reference"

    # Case 2: multi-tile ragged batch (200 rows, 64-row tiles), h stash enabled.
    x_big = jax.random.normal(kx2, (200, emb_dim), jnp.float32)
    ref2 = reference_forward(x_big, *params, matmul_dtype=jnp.bfloat16)
    out2 = jax.block_until_ready(gate_forward_padded(x_big, *params, tile_n=64))
    assert jnp.allclose(out2[:, :gate_dim].astype(jnp.float32), ref2,
                        atol=2e-2, rtol=2e-2), "case 2 mismatch vs reference"

    # Case 3: same shapes, recompute fallback path (stash disabled, as for huge N).
    out3 = jax.block_until_ready(
        gate_forward_padded(x_big, *params, tile_n=64, stash_h=False))
    assert jnp.allclose(out3[:, :gate_dim].astype(jnp.float32), ref2,
                        atol=2e-2, rtol=2e-2), "case 3 mismatch vs reference"

    # Module-faithful API (performs the extra slice pass; shape check only).
    out4 = jax.block_until_ready(gate_forward(x_small, *params))
    assert out4.shape == (8, gate_dim)

    print("KERNEL_OK")
</pallas_src>

<mosaic_0001>
module attributes {stable_mosaic.version = 11 : i64} {
  func.func @gate_kernel(%arg0: i32, %arg1: i32, %arg2: memref<8x32xf32, #tpu.memory_space<vmem>>, %arg3: memref<32x384xbf16, #tpu.memory_space<vmem>>, %arg4: memref<384x384xbf16, #tpu.memory_space<vmem>>, %arg5: memref<1x384xf32, #tpu.memory_space<vmem>>, %arg6: memref<1x384xf32, #tpu.memory_space<vmem>>, %arg7: memref<1x384xf32, #tpu.memory_space<vmem>>, %arg8: memref<8x384xbf16, #tpu.memory_space<vmem>>, %arg9: memref<1x384xf32, #tpu.memory_space<vmem>>, %arg10: memref<1x384xf32, #tpu.memory_space<vmem>>, %arg11: memref<1x384xf32, #tpu.memory_space<vmem>>, %arg12: memref<1x384xf32, #tpu.memory_space<vmem>>, %arg13: memref<1x384xf32, #tpu.memory_space<vmem>>, %arg14: memref<1x8x384xbf16, #tpu.memory_space<vmem>>) attributes {dimension_semantics = [#tpu.dimension_semantics<arbitrary>, #tpu.dimension_semantics<arbitrary>], iteration_bounds = array<i64: 2, 1>, scalar_prefetch = 0 : i64, scratch_operands = 6 : i64, tpu.core_type = #tpu.core_type<tc>, window_params = [{transform_indices = @transform_0, window_bounds = array<i64: 8, 32>}, {pipeline_mode = #tpu.pipeline_mode<synchronous>, transform_indices = @transform_1, window_bounds = array<i64: 32, 384>}, {pipeline_mode = #tpu.pipeline_mode<synchronous>, transform_indices = @transform_2, window_bounds = array<i64: 384, 384>}, {pipeline_mode = #tpu.pipeline_mode<synchronous>, transform_indices = @transform_3, window_bounds = array<i64: 1, 384>}, {pipeline_mode = #tpu.pipeline_mode<synchronous>, transform_indices = @transform_4, window_bounds = array<i64: 1, 384>}, {pipeline_mode = #tpu.pipeline_mode<synchronous>, transform_indices = @transform_5, window_bounds = array<i64: 1, 384>}, {transform_indices = @transform_6, window_bounds = array<i64: 8, 384>}]} {
    %c0_i32 = arith.constant 0 : i32
    %0 = arith.cmpi eq, %arg0, %c0_i32 : i32
    %1 = arith.extui %0 : i1 to i32
    %c0_i32_0 = arith.constant 0 : i32
    %2 = arith.cmpi ne, %1, %c0_i32_0 : i32
    scf.if %2 {
      %c0_i32_2 = arith.constant 0 : i32
      %6 = arith.cmpi eq, %arg1, %c0_i32_2 : i32
      %7 = arith.extui %6 : i1 to i32
      %c0_i32_3 = arith.constant 0 : i32
      %8 = arith.cmpi ne, %7, %c0_i32_3 : i32
      scf.if %8 {
        %cst_23 = arith.constant 0.000000e+00 : f32
        %35 = vector.broadcast %cst_23 : f32 to vector<1x384xf32>
        %c0_24 = arith.constant 0 : index
        %c0_25 = arith.constant 0 : index
        %36 = vector.load %arg9[%c0_24, %c0_25] : memref<1x384xf32, #tpu.memory_space<vmem>>, vector<1x384xf32>
        tpu.vector_store %arg9[%c0_24, %c0_25], %35 {strides = array<i32>} : memref<1x384xf32, #tpu.memory_space<vmem>>, vector<1x384xf32>,
        %cst_26 = arith.constant 0.000000e+00 : f32
        %37 = vector.broadcast %cst_26 : f32 to vector<1x384xf32>
        %c0_27 = arith.constant 0 : index
        %c0_28 = arith.constant 0 : index
        %38 = vector.load %arg10[%c0_27, %c0_28] : memref<1x384xf32, #tpu.memory_space<vmem>>, vector<1x384xf32>
        tpu.vector_store %arg10[%c0_27, %c0_28], %37 {strides = array<i32>} : memref<1x384xf32, #tpu.memory_space<vmem>>, vector<1x384xf32>,
      } else {
      }
      %c0 = arith.constant 0 : index
      %c0_4 = arith.constant 0 : index
      %9 = vector.load %arg2[%c0, %c0_4] : memref<8x32xf32, #tpu.memory_space<vmem>>, vector<8x32xf32>
      %10 = arith.truncf %9 : vector<8x32xf32> to vector<8x32xbf16>
      %c0_5 = arith.constant 0 : index
      %c0_6 = arith.constant 0 : index
      %11 = vector.load %arg3[%c0_5, %c0_6] : memref<32x384xbf16, #tpu.memory_space<vmem>>, vector<32x384xbf16>
      %cst = arith.constant dense<0.000000e+00> : vector<8x384xf32>
      %12 = tpu.matmul %10, %11, %cst {dimension_numbers = #tpu.dot_dimension_numbers<[1], [0], [0], [1], [0, 0, 1, 1], [], []>} : vector<8x32xbf16>, vector<32x384xbf16>, vector<8x384xf32> -> vector<8x384xf32>
      %cst_7 = arith.constant dense<0.000000e+00> : vector<384xf32>
      %13 = vector.multi_reduction <add>, %12, %cst_7 [0] : vector<8x384xf32> to vector<384xf32>
      %14 = vector.shape_cast %13 : vector<384xf32> to vector<1x384xf32>
      %c0_i32_8 = arith.constant 0 : i32
      %15 = arith.cmpi eq, %arg1, %c0_i32_8 : i32
      %16 = arith.extui %15 : i1 to i32
      %c0_i32_9 = arith.constant 0 : i32
      %17 = arith.cmpi ne, %16, %c0_i32_9 : i32
      scf.if %17 {
        %cst_23 = arith.constant 1.250000e-01 : f32
        %35 = vector.broadcast %cst_23 : f32 to vector<1x384xf32>
        %36 = arith.mulf %14, %35 : vector<1x384xf32>
        %c0_24 = arith.constant 0 : index
        %c0_25 = arith.constant 0 : index
        %37 = vector.load %arg11[%c0_24, %c0_25] : memref<1x384xf32, #tpu.memory_space<vmem>>, vector<1x384xf32>
        tpu.vector_store %arg11[%c0_24, %c0_25], %36 {strides = array<i32>} : memref<1x384xf32, #tpu.memory_space<vmem>>, vector<1x384xf32>,
      } else {
      }
      %c0_10 = arith.constant 0 : index
      %c0_11 = arith.constant 0 : index
      %18 = vector.load %arg9[%c0_10, %c0_11] : memref<1x384xf32, #tpu.memory_space<vmem>>, vector<1x384xf32>
      %19 = arith.addf %18, %14 : vector<1x384xf32>
      %c0_12 = arith.constant 0 : index
      %c0_13 = arith.constant 0 : index
      %20 = vector.load %arg9[%c0_12, %c0_13] : memref<1x384xf32, #tpu.memory_space<vmem>>, vector<1x384xf32>
      tpu.vector_store %arg9[%c0_12, %c0_13], %19 {strides = array<i32>} : memref<1x384xf32, #tpu.memory_space<vmem>>, vector<1x384xf32>,
      %c0_14 = arith.constant 0 : index
      %c0_15 = arith.constant 0 : index
      %21 = vector.load %arg11[%c0_14, %c0_15] : memref<1x384xf32, #tpu.memory_space<vmem>>, vector<1x384xf32>
      %22 = vector.broadcast %21 : vector<1x384xf32> to vector<8x384xf32>
      %23 = arith.subf %12, %22 : vector<8x384xf32>
      %c0_16 = arith.constant 0 : index
      %c0_17 = arith.constant 0 : index
      %24 = vector.load %arg10[%c0_16, %c0_17] : memref<1x384xf32, #tpu.memory_space<vmem>>, vector<1x384xf32>
      %25 = arith.mulf %23, %23 : vector<8x384xf32>
      %cst_18 = arith.constant dense<0.000000e+00> : vector<384xf32>
      %26 = vector.multi_reduction <add>, %25, %cst_18 [0] : vector<8x384xf32> to vector<384xf32>
      %27 = vector.shape_cast %26 : vector<384xf32> to vector<1x384xf32>
      %28 = arith.addf %24, %27 : vector<1x384xf32>
      %c0_19 = arith.constant 0 : index
      %c0_20 = arith.constant 0 : index
      %29 = vector.load %arg10[%c0_19, %c0_20] : memref<1x384xf32, #tpu.memory_space<vmem>>, vector<1x384xf32>
      tpu.vector_store %arg10[%c0_19, %c0_20], %28 {strides = array<i32>} : memref<1x384xf32, #tpu.memory_space<vmem>>, vector<1x384xf32>,
      %30 = arith.truncf %12 : vector<8x384xf32> to vector<8x384xbf16>
      %31 = arith.index_cast %arg1 : i32 to index
      %c0_21 = arith.constant 0 : index
      %c0_22 = arith.constant 0 : index
      %32 = vector.load %arg14[%31, %c0_21, %c0_22] : memref<1x8x384xbf16, #tpu.memory_space<vmem>>, vector<1x8x384xbf16>
      %33 = vector.shape_cast %32 : vector<1x8x384xbf16> to vector<8x384xbf16>
      %34 = vector.shape_cast %30 : vector<8x384xbf16> to vector<1x8x384xbf16>
      tpu.vector_store %arg14[%31, %c0_21, %c0_22], %34 {strides = array<i32>} : memref<1x8x384xbf16, #tpu.memory_space<vmem>>, vector<1x8x384xbf16>,
    } else {
    }
    %c1_i32 = arith.constant 1 : i32
    %3 = arith.cmpi eq, %arg0, %c1_i32 : i32
    %4 = arith.extui %3 : i1 to i32
    %c0_i32_1 = arith.constant 0 : i32
    %5 = arith.cmpi ne, %4, %c0_i32_1 : i32
    scf.if %5 {
      %c0_i32_2 = arith.constant 0 : i32
      %6 = arith.cmpi eq, %arg1, %c0_i32_2 : i32
      %7 = arith.extui %6 : i1 to i32
      %c0_i32_3 = arith.constant 0 : i32
      %8 = arith.cmpi ne, %7, %c0_i32_3 : i32
      scf.if %8 {
        %c0_16 = arith.constant 0 : index
        %c0_17 = arith.constant 0 : index
        %29 = vector.load %arg9[%c0_16, %c0_17] : memref<1x384xf32, #tpu.memory_space<vmem>>, vector<1x384xf32>
        %cst_18 = arith.constant 1.250000e-01 : f32
        %30 = vector.broadcast %cst_18 : f32 to vector<1x384xf32>
        %31 = arith.mulf %29, %30 : vector<1x384xf32>
        %c0_19 = arith.constant 0 : index
        %c0_20 = arith.constant 0 : index
        %32 = vector.load %arg11[%c0_19, %c0_20] : memref<1x384xf32, #tpu.memory_space<vmem>>, vector<1x384xf32>
        %33 = arith.subf %31, %32 : vector<1x384xf32>
        %c0_21 = arith.constant 0 : index
        %c0_22 = arith.constant 0 : index
        %34 = vector.load %arg10[%c0_21, %c0_22] : memref<1x384xf32, #tpu.memory_space<vmem>>, vector<1x384xf32>
        %cst_23 = arith.constant 1.250000e-01 : f32
        %35 = vector.broadcast %cst_23 : f32 to vector<1x384xf32>
        %36 = arith.mulf %34, %35 : vector<1x384xf32>
        %37 = arith.mulf %33, %33 : vector<1x384xf32>
        %38 = arith.subf %36, %37 : vector<1x384xf32>
        %cst_24 = arith.constant 0.000000e+00 : f32
        %39 = vector.broadcast %cst_24 : f32 to vector<1x384xf32>
        %40 = arith.maximumf %38, %39 : vector<1x384xf32>
        %c0_25 = arith.constant 0 : index
        %c0_26 = arith.constant 0 : index
        %41 = vector.load %arg6[%c0_25, %c0_26] : memref<1x384xf32, #tpu.memory_space<vmem>>, vector<1x384xf32>
        %cst_27 = arith.constant 9.99999974E-6 : f32
        %42 = vector.broadcast %cst_27 : f32 to vector<1x384xf32>
        %43 = arith.addf %40, %42 : vector<1x384xf32>
        %44 = math.rsqrt %43 : vector<1x384xf32>
        %45 = arith.mulf %41, %44 : vector<1x384xf32>
        %c0_28 = arith.constant 0 : index
        %c0_29 = arith.constant 0 : index
        %46 = vector.load %arg12[%c0_28, %c0_29] : memref<1x384xf32, #tpu.memory_space<vmem>>, vector<1x384xf32>
        tpu.vector_store %arg12[%c0_28, %c0_29], %45 {strides = array<i32>} : memref<1x384xf32, #tpu.memory_space<vmem>>, vector<1x384xf32>,
        %c0_30 = arith.constant 0 : index
        %c0_31 = arith.constant 0 : index
        %47 = vector.load %arg7[%c0_30, %c0_31] : memref<1x384xf32, #tpu.memory_space<vmem>>, vector<1x384xf32>
        %48 = arith.mulf %31, %45 : vector<1x384xf32>
        %49 = arith.subf %47, %48 : vector<1x384xf32>
        %c0_32 = arith.constant 0 : index
        %c0_33 = arith.constant 0 : index
        %50 = vector.load %arg13[%c0_32, %c0_33] : memref<1x384xf32, #tpu.memory_space<vmem>>, vector<1x384xf32>
        tpu.vector_store %arg13[%c0_32, %c0_33], %49 {strides = array<i32>} : memref<1x384xf32, #tpu.memory_space<vmem>>, vector<1x384xf32>,
      } else {
      }
      %9 = arith.index_cast %arg1 : i32 to index
      %c0 = arith.constant 0 : index
      %c0_4 = arith.constant 0 : index
      %10 = vector.load %arg14[%9, %c0, %c0_4] : memref<1x8x384xbf16, #tpu.memory_space<vmem>>, vector<1x8x384xbf16>
      %11 = vector.shape_cast %10 : vector<1x8x384xbf16> to vector<8x384xbf16>
      %12 = arith.extf %11 : vector<8x384xbf16> to vector<8x384xf32>
      %c0_5 = arith.constant 0 : index
      %c0_6 = arith.constant 0 : index
      %13 = vector.load %arg12[%c0_5, %c0_6] : memref<1x384xf32, #tpu.memory_space<vmem>>, vector<1x384xf32>
      %14 = vector.broadcast %13 : vector<1x384xf32> to vector<8x384xf32>
      %15 = arith.mulf %12, %14 : vector<8x384xf32>
      %c0_7 = arith.constant 0 : index
      %c0_8 = arith.constant 0 : index
      %16 = vector.load %arg13[%c0_7, %c0_8] : memref<1x384xf32, #tpu.memory_space<vmem>>, vector<1x384xf32>
      %17 = vector.broadcast %16 : vector<1x384xf32> to vector<8x384xf32>
      %18 = arith.addf %15, %17 : vector<8x384xf32>
      %cst = arith.constant 0.000000e+00 : f32
      %19 = vector.broadcast %cst : f32 to vector<8x384xf32>
      %20 = arith.maximumf %18, %19 : vector<8x384xf32>
      %21 = arith.truncf %20 : vector<8x384xf32> to vector<8x384xbf16>
      %c0_9 = arith.constant 0 : index
      %c0_10 = arith.constant 0 : index
      %22 = vector.load %arg4[%c0_9, %c0_10] : memref<384x384xbf16, #tpu.memory_space<vmem>>, vector<384x384xbf16>
      %cst_11 = arith.constant dense<0.000000e+00> : vector<8x384xf32>
      %23 = tpu.matmul %21, %22, %cst_11 {dimension_numbers = #tpu.dot_dimension_numbers<[1], [0], [0], [1], [0, 0, 1, 1], [], []>} : vector<8x384xbf16>, vector<384x384xbf16>, vector<8x384xf32> -> vector<8x384xf32>
      %c0_12 = arith.constant 0 : index
      %c0_13 = arith.constant 0 : index
      %24 = vector.load %arg5[%c0_12, %c0_13] : memref<1x384xf32, #tpu.memory_space<vmem>>, vector<1x384xf32>
      %25 = vector.broadcast %24 : vector<1x384xf32> to vector<8x384xf32>
      %26 = arith.addf %23, %25 : vector<8x384xf32>
      %27 = arith.truncf %26 : vector<8x384xf32> to vector<8x384xbf16>
      %c0_14 = arith.constant 0 : index
      %c0_15 = arith.constant 0 : index
      %28 = vector.load %arg8[%c0_14, %c0_15] : memref<8x384xbf16, #tpu.memory_space<vmem>>, vector<8x384xbf16>
      tpu.vector_store %arg8[%c0_14, %c0_15], %27 {strides = array<i32>} : memref<8x384xbf16, #tpu.memory_space<vmem>>, vector<8x384xbf16>,
    } else {
    }
    return
  }
  func.func @transform_0(%arg0: i32, %arg1: i32) -> (i32, i32) {
    %c1_i32 = arith.constant 1 : i32
    %0 = arith.subi %c1_i32, %arg0 : i32
    %1 = arith.muli %arg1, %0 : i32
    %c0_i32 = arith.constant 0 : i32
    %c0_i32_0 = arith.constant 0 : i32
    return %1, %c0_i32 : i32, i32
  }
  func.func @transform_1(%arg0: i32, %arg1: i32) -> (i32, i32) {
    %c0_i32 = arith.constant 0 : i32
    %c0_i32_0 = arith.constant 0 : i32
    %c0_i32_1 = arith.constant 0 : i32
    return %c0_i32, %c0_i32_0 : i32, i32
  }
  func.func @transform_2(%arg0: i32, %arg1: i32) -> (i32, i32) {
    %c0_i32 = arith.constant 0 : i32
    %c0_i32_0 = arith.constant 0 : i32
    %c0_i32_1 = arith.constant 0 : i32
    return %c0_i32, %c0_i32_0 : i32, i32
  }
  func.func @transform_3(%arg0: i32, %arg1: i32) -> (i32, i32) {
    %c0_i32 = arith.constant 0 : i32
    %c0_i32_0 = arith.constant 0 : i32
    %c0_i32_1 = arith.constant 0 : i32
    return %c0_i32, %c0_i32_0 : i32, i32
  }
  func.func @transform_4(%arg0: i32, %arg1: i32) -> (i32, i32) {
    %c0_i32 = arith.constant 0 : i32
    %c0_i32_0 = arith.constant 0 : i32
    %c0_i32_1 = arith.constant 0 : i32
    return %c0_i32, %c0_i32_0 : i32, i32
  }
  func.func @transform_5(%arg0: i32, %arg1: i32) -> (i32, i32) {
    %c0_i32 = arith.constant 0 : i32
    %c0_i32_0 = arith.constant 0 : i32
    %c0_i32_1 = arith.constant 0 : i32
    return %c0_i32, %c0_i32_0 : i32, i32
  }
  func.func @transform_6(%arg0: i32, %arg1: i32) -> (i32, i32) {
    %0 = arith.muli %arg0, %arg1 : i32
    %c0_i32 = arith.constant 0 : i32
    %c0_i32_0 = arith.constant 0 : i32
    return %0, %c0_i32 : i32, i32
  }
}

</mosaic_0001>

<bundles_post_ra>
// kernel: tpu_custom_call.1
= control target key start
LH: loop header
LB: loop body
LE: loop exit
PB: predicated region body
PF: predicated region fallthrough
CT: control target
= control target key end

     0   :  { %11 = vsyncpa [#allocation9], 0  ;;  %s2219_s0 = inlined_call_operand.hbm [shape: f32[8,32], index: 0, kind: input, shape index: {}]   ;;  %s2220_s1 = inlined_call_operand.hbm [shape: bf16[32,384], index: 1, kind: input, shape index: {}]   ;;  %s2221_s2 = inlined_call_operand.hbm [shape: bf16[384,384], index: 2, kind: input, shape index: {}]   ;;  %s2222_s3 = inlined_call_operand.vmem [shape: f32[1,384], index: 3, kind: input, shape index: {}]   ;;  %s2223_s4 = inlined_call_operand.vmem [shape: f32[1,384], index: 4, kind: input, shape index: {}]   ;;  %s2224_s5 = inlined_call_operand.vmem [shape: f32[1,384], index: 5, kind: input, shape index: {}]   ;;  %s2225_s6 = inlined_call_operand.hbm [shape: bf16[8,384], index: 6, kind: output, shape index: {}]  }
   0x1   :  { %13 = vsyncpa [#allocation9 + $0x1], 0 }
   0x2   :  { %14 = vsyncpa [#allocation12], 0 }
   0x3   :  { %15 = vsyncpa [#allocation10], 0 }
   0x4   :  { %17 = vsyncpa [#allocation10 + $0x1], 0  ;;  %s2052_s21 = smov 0   ;;  %s2054_s22 = smov 0  }
   0x5   :  { %s2056_s23 = smov 0  }
   0x6 LB: > { %s1515_s24 = sadd.s32 4294967295, %s2002_s23   ;;  %s1516_s25 = sadd.s32 4294967294, %s2002_s23   ;;  %s2002_s23 = sphi %s2056_s23, %s23_s23   ;;  %s1998_s22 = sphi %s2054_s22, %s2237_s22   ;;  %s1994_s21 = sphi %s2052_s21, %s2236_s21  }
   0x7   : > { %s35_s26 = sadd.s32 1, %s1998_s22  ;;  %p1517_p0 = scmp.ge.s32.totalorder %s2002_s23, 1 }
   0x8   : > { %p37_p1 = scmp.ge.s32.totalorder %s35_s26, 2  ;;  %p203_p2 = scmp.lt.s32.totalorder %s2002_s23, 3 }
   0x9   : > { %p2074_p3 = scmp.eq.s32.totalorder %s1515_s24, 0  ;;  %s2004_s29 = smov [#allocation11]  }
   0xa   : > { %s2239_s26 = smov (%p37_p1, %s35_s26), 0  ;;  %p2080_p4 = pnand %p1517_p0, %p203_p2 }
   0xb   : > { %s215_s30 = sshll.u32 %s2004_s29, 4  ;;  %p1715_p8 = scmp.lt.s32.totalorder %s2002_s23, 2  ;;  %s216_s30 = int_to_ptr.vmem [resolvable:$true] %s215_s30 }
   0xc   : > { %p1698_p5 = pneg %p2080_p4  ;;  %s2005_s8 = smov [#allocation13]  }
   0xd   : > { %s228_s9 = sshll.u32 %s2005_s8, 4  ;;  %s1877_s10 = scalar_lea.vmem %s216_s30, 768  ;;  %s229_s9 = int_to_ptr.vmem [resolvable:$true] %s228_s9 }
   0xe   : > { %p2089_p7 = pnand %p2074_p3, %p1698_p5  ;;  %p1878_p10 = scmp.ne.s32.totalorder %s216_s30, %s1877_s10 }
   0xf   : > { %p1885_p13 = scmp.lt.s32.totalorder %s216_s30, %s216_s30  ;;  %p1886_p0 = scmp.lt.s32.totalorder %s1877_s10, %s1877_s10 }
  0x10   : > { %p1868_p9 = pneg %p2089_p7 }
  0x11   : > { %p1887_p1 = por %p1886_p0, %p1885_p13 }
  0x12   : > { %p1880_p11 = pnand %p1878_p10, %p1868_p9 }
  0x14   : > { %p1881_p12 = pneg %p1880_p11 }
  0x16   : > { %p1888_p2 = pnand %p1887_p1, %p1881_p12 }
  0x18   : > { %1891 = shalt.err (!%p1888_p2)
}
  0x19   : > { %s2006_s11 = smov 192   ;;  %s2007_s12 = smov 12  }
  0x1a   : > { %1701 = dma.hbm_to_vmem [thread:$0]  (!%p2089_p7), %s2220_s1, 768, %s216_s30, [#allocation12], %s2006_s11, %s2006_s11, %s2007_s12  }
  0x1b   : > { %p1716_p5 = scmp.eq.s32.totalorder %s2002_s23, 0  ;;  %s1903_s15 = scalar_lea.vmem %s229_s9, 9216 }
  0x1c   : > { %p1904_p10 = scmp.ne.s32.totalorder %s229_s9, %s1903_s15  ;;  %p1911_p12 = scmp.lt.s32.totalorder %s229_s9, %s229_s9 }
  0x1d   : > { %p1912_p0 = scmp.lt.s32.totalorder %s1903_s15, %s1903_s15 }
  0x1e   : > { %p1906_p11 = pnand %p1904_p10, %p1868_p9 }
  0x1f   : > { %p1913_p1 = por %p1912_p0, %p1911_p12 }
  0x20   : > { %p1907_p13 = pneg %p1906_p11 }
  0x22   : > { %p1914_p2 = pnand %p1913_p1, %p1907_p13 }
  0x24   : > { %1917 = shalt.err (!%p1914_p2)
}
  0x25   : > { %1704 = dma.hbm_to_vmem [thread:$0]  (!%p2089_p7), %s2221_s2, 9216, %s229_s9, [#allocation12], %s2006_s11, %s2006_s11, %s2007_s12  }
  0x26   : > { %p2115_p6 = pnand %p1716_p5, %p1715_p8  ;;  %s2008_s19 = smov [#allocation8]  }
  0x27   : > { %s264_s20 = sshll.u32 %s2008_s19, 4  ;;  %s265_s20 = int_to_ptr.vmem [resolvable:$true] %s264_s20 }
  0x28   : > { %p1920_p9 = pneg %p2115_p6  ;;  %s1929_s29 = scalar_lea.vmem %s265_s20, 128 }
  0x29   : > { %p1930_p10 = scmp.ne.s32.totalorder %s265_s20, %s1929_s29  ;;  %s1936_s30 = scalar_lea.vmem %s265_s20, 256 }
  0x2a   : > { %p1937_p12 = scmp.lt.s32.totalorder %s265_s20, %s265_s20  ;;  %p1938_p0 = scmp.lt.s32.totalorder %s1936_s30, %s1929_s29 }
  0x2b   : > { %p1932_p11 = pnand %p1930_p10, %p1920_p9 }
  0x2c   : > { %p1939_p1 = por %p1938_p0, %p1937_p12 }
  0x2d   : > { %p1933_p13 = pneg %p1932_p11 }
  0x2f   : > { %p1940_p7 = pnand %p1939_p1, %p1933_p13 }
  0x31   : > { %1943 = shalt.err (!%p1940_p7)
}
  0x32   : > { %1708 = dma.hbm_to_vmem [thread:$0]  (!%p2115_p6), %s2219_s0, 128, %s265_s20, [#allocation9]  }
  0x33   : > { %273 = sbr.rel (%p2080_p4) target bundleno = 646 (0x286), region = 44 }
  0x38   : > { %1981 = dma.done.wait (%p2074_p3), [#allocation9], 128  }
  0x39   : > { %1983 = vsyncadd (%p2074_p3), [#allocation9], 4294967168 }
  0x3a   : > { %1985 = dma.done.wait (%p2074_p3), [#allocation12], 9984  }
  0x3b   : > { %1987 = vsyncadd (%p2074_p3), [#allocation12], 4294957312  ;;  %p1526_p8 = scmp.ne.s32.totalorder %s1994_s21, 0 }
  0x3d   : > { %323 = sbr.rel (%p1526_p8) target bundleno = 330 (0x14a), region = 60 }
  0x42   : > { %v328_v0 = vlaneseq  ;;  %v1760_v1 = vld [vmem:[#allocation11 + $0x1c] ss:$12 sps:$4 sm:$0xff]   ;;  %v2009_v2 = vmov 0.0   ;;  %v1762_v3 = vld [vmem:[#allocation11 + $0x20] ss:$12 sps:$4 sm:$0xff]   ;;  %vm2010_vm0 = vmmov 0  }
  0x43   : > { %1654 = vmatprep.subr.bf16.mxu1 %v2009_v2  ;;  %1658 = vmatprep.mubr.msk.bf16.mxu1 %vm2010_vm0, %v2009_v2  ;;  %v1763_v5 = vld [vmem:[#allocation11 + $0x18] ss:$12 sps:$4 sm:$0xff]   ;;  %v2011_v7 = vmov 0   ;;  %v1766_v8 = vld [vmem:[#allocation11 + $0x8] ss:$12 sps:$4 sm:$0xff]   ;;  %vm376_vm2 = vcmask 261120  }
  0x44   : > { %vm2137_vm1 = vcmp.lt.s32.totalorder %v328_v0, 384  ;;  %392 = vmatprep.subr.bf16.mxu0 %v1760_v1  ;;  %1655 = vmatpush3.bf16.msra.mxu1 %v1762_v3  ;;  %v1764_v6 = vld [vmem:[#allocation11 + $0x4] ss:$12 sps:$4 sm:$0xff]   ;;  %v1767_v9 = vld [vmem:[#allocation11] ss:$12 sps:$4 sm:$0xff]   ;;  %v493_v37 = vshrl.u32 %v328_v0, 7 }
  0x45   : > { %332 = vst.msk [vmem:[#allocation2] sm:$0x7] %vm2137_vm1, %v2009_v2  ;;  %333 = vst.msk [vmem:[#allocation3] sm:$0x7] %vm2137_vm1, %v2009_v2  ;;  %412 = vmatprep.mubr.bf16.mxu0 %v2011_v7  ;;  %393 = vmatpush1.bf16.msra.mxu0 %v1763_v5  ;;  %v334_v10 = vld [vmem:[#allocation8] sm:$0xff] }
  0x46   : > { %1656 = vmatprep.subr.bf16.mxu1 %v2009_v2  ;;  %394 = vmatprep.subr.bf16.mxu0 %v1764_v6  ;;  %v335_v11 = vpack.c.bf16 %v334_v10, %v334_v10  ;;  %v2012_v26 = vmov 1966171168   ;;  %v555_v60 = vsub.s32 0, %v493_v37  ;;  %v559_v61 = vsub.s32 1, %v493_v37 }
  0x47   : > { %v490_v27 = vunpack.c.l.s4 %v2012_v26  ;;  %v563_v62 = vsub.s32 2, %v493_v37 }
  0x48   : > { %1657 = vmatpush3.bf16.msra.mxu1 %v1766_v8 }
  0x49   : > { %395 = vmatpush1.bf16.msra.mxu0 %v1767_v9  ;;  %v491_v36 = vunpack.c.0.s8 %v490_v27 }
  0x4b   : > { %1659 = vmatmul.mubr.msk.bf16.vlgmr.msra.gmra.mxu1 %vm376_vm2, %v335_v11  ;;  %v494_v43 = vsub.s32 %v491_v36, %v493_v37 }
  0x4c   : > { %1533 = vmatmul.mubr.msk.bf16.vlgmr.msra.gmra.mxu0 %vm376_vm2, %v335_v11  ;;  %v517_v55 = vld [vmem:[#allocation2] sm:$0x7] }
 0x10b   : > { %v455_v12 = vpop.f32.mrf.mxu1 }
 0x10c   : > { %v473_v13 = vrot.slane %v455_v12, 4  ;;  %v1617_v14 = vpack.c.bf16 %v455_v12, %v455_v12  ;;  %v414_v15 = vpop.f32.mrf.mxu0 }
 0x10d   : > { %v461_v16 = vrot.slane %v414_v15, 4  ;;  %v1660_v17 = vpop.f32.mrf.mxu1 }
 0x10e   : > { %v474_v18 = vadd.f32 %v473_v13, %v455_v12  ;;  %639 = vst [vmem:[#allocation7 + $0x8] sm:$0xf] %v1617_v14  ;;  %v416_v19 = vpop.f32.mrf.mxu0 }
 0x10f   : > { %v462_v20 = vadd.f32 %v461_v16, %v414_v15  ;;  %v467_v21 = vrot.slane %v416_v19, 4  ;;  %v1616_v22 = vpack.c.bf16 %v416_v19, %v414_v15  ;;  %v458_v23 = vpop.f32.mrf.mxu1 }
 0x110   : > { %v475_v24 = vrot.slane %v474_v18, 2  ;;  %v418_v25 = vpop.f32.mrf.mxu0 }
 0x111   : > { %v463_v28 = vrot.slane %v462_v20, 2  ;;  %v468_v29 = vadd.f32 %v467_v21, %v416_v19  ;;  %638 = vst [vmem:[#allocation7] sm:$0xff] %v1616_v22  ;;  %v1661_v30 = vpop.f32.mrf.mxu1 }
 0x112   : > { %v476_v31 = vadd.f32 %v475_v24, %v474_v18  ;;  %v419_v32 = vpop.f32.mrf.mxu0 }
 0x113   : > { %v464_v33 = vadd.f32 %v463_v28, %v462_v20  ;;  %v469_v34 = vrot.slane %v468_v29, 2  ;;  %v571_v32 = vld [vmem:[#allocation3] sm:$0x7] }
 0x114   : > { %v477_v35 = vrot.slane %v476_v31, 1 }
 0x115   : > { %v465_v38 = vrot.slane %v464_v33, 1  ;;  %v470_v39 = vadd.f32 %v469_v34, %v468_v29 }
 0x116   : > { %v478_v40 = vadd.f32 %v477_v35, %v476_v31 }
 0x117   : > { %v466_v41 = vadd.f32 %v465_v38, %v464_v33  ;;  %v471_v42 = vrot.slane %v470_v39, 1 }
 0x118   : > { %v484_v45 = vmul.f32 0.125, %v478_v40  ;;  %v535_v49 = vrot.slane %v478_v40, %v494_v43 }
 0x119   : > { %v472_v44 = vadd.f32 %v471_v42, %v470_v39  ;;  %v482_v46 = vmul.f32 0.125, %v466_v41 }
 0x11a   : > { %v502_v52 = vrot.slane %v484_v45, %v494_v43 }
 0x11b   : > { %v483_v47 = vmul.f32 0.125, %v472_v44  ;;  %v521_v48 = vcombine.low %v466_v41, %v472_v44 }
 0x11d   : > { %v488_v50 = vcombine.low %v482_v46, %v483_v47  ;;  %v528_v51 = vrot.slane %v521_v48, %v494_v43 }
 0x11f   : > { %v495_v53 = vrot.slane %v488_v50, %v494_v43  ;;  %v536_v54 = vcombine.low %v528_v51, %v535_v49 }
 0x121   : > { %v503_v56 = vcombine.low %v495_v53, %v502_v52  ;;  %v543_v57 = vrot.slane %v536_v54, %v494_v43 }
 0x123   : > { %v510_v58 = vrot.slane %v503_v56, %v494_v43  ;;  %v545_v59 = vadd.f32 %v543_v57, %v517_v55 }
 0x125   : > { %516 = vst.msk [vmem:[#allocation4] sm:$0x7] %vm2137_vm1, %v510_v58  ;;  %550 = vst.msk [vmem:[#allocation2] sm:$0x7] %vm2137_vm1, %v545_v59 }
 0x12c   : > { %v551_v63 = vld [vmem:[#allocation4] sm:$0x7] }
 0x12d   : > { %v556_v0 = vrot.slane %v551_v63, %v555_v60  ;;  %v560_v1 = vrot.slane %v551_v63, %v559_v61  ;;  %v564_v2 = vrot.slane %v551_v63, %v563_v62 }
 0x12f   : > { %v568_v3 = vsub.f32 %v414_v15, %v556_v0  ;;  %v569_v5 = vsub.f32 %v416_v19, %v560_v1  ;;  %v570_v6 = vsub.f32 %v455_v12, %v564_v2 }
 0x131   : > { %v572_v7 = vmul.f32 %v568_v3, %v568_v3  ;;  %v573_v8 = vmul.f32 %v569_v5, %v569_v5  ;;  %v574_v9 = vmul.f32 %v570_v6, %v570_v6 }
 0x133   : > { %v575_v10 = vrot.slane %v572_v7, 4  ;;  %v581_v11 = vrot.slane %v573_v8, 4  ;;  %v587_v13 = vrot.slane %v574_v9, 4 }
 0x135   : > { %v576_v14 = vadd.f32 %v575_v10, %v572_v7  ;;  %v582_v16 = vadd.f32 %v581_v11, %v573_v8  ;;  %v588_v17 = vadd.f32 %v587_v13, %v574_v9 }
 0x137   : > { %v577_v18 = vrot.slane %v576_v14, 2  ;;  %v583_v20 = vrot.slane %v582_v16, 2  ;;  %v589_v21 = vrot.slane %v588_v17, 2 }
 0x139   : > { %v578_v22 = vadd.f32 %v577_v18, %v576_v14  ;;  %v584_v23 = vadd.f32 %v583_v20, %v582_v16  ;;  %v590_v24 = vadd.f32 %v589_v21, %v588_v17 }
 0x13b   : > { %v579_v25 = vrot.slane %v578_v22, 1  ;;  %v585_v26 = vrot.slane %v584_v23, 1  ;;  %v591_v15 = vrot.slane %v590_v24, 1 }
 0x13d   : > { %v580_v19 = vadd.f32 %v579_v25, %v578_v22  ;;  %v586_v12 = vadd.f32 %v585_v26, %v584_v23  ;;  %v592_v27 = vadd.f32 %v591_v15, %v590_v24 }
 0x13f   : > { %v596_v28 = vcombine.low %v580_v19, %v586_v12  ;;  %v610_v30 = vrot.slane %v592_v27, %v494_v43 }
 0x141   : > { %v603_v29 = vrot.slane %v596_v28, %v494_v43 }
 0x143   : > { %v611_v31 = vcombine.low %v603_v29, %v610_v30 }
 0x145   : > { %v618_v33 = vrot.slane %v611_v31, %v494_v43 }
 0x147   : > { %v620_v34 = vadd.f32 %v618_v33, %v571_v32 }
 0x149   : > { %621 = vst.msk [vmem:[#allocation3] sm:$0x7] %vm2137_vm1, %v620_v34 }
 0x14a PF: > { %p1537_p3 = scmp.ne.s32.totalorder %s1994_s21, 1 }
 0x14c   : > { %643 = sbr.rel (%p1537_p3) target bundleno = 633 (0x279), region = 72 }
 0x151   : > { %v1768_v35 = vld [vmem:[#allocation13 + $0xac] ss:$12 sps:$4 sm:$0xff]   ;;  %v1770_v36 = vld [vmem:[#allocation13 + $0xa8] ss:$12 sps:$4 sm:$0xff]   ;;  %v2013_v37 = vmov 0   ;;  %v661_v12 = vlaneseq  ;;  %vm2015_vm4 = vmmov 0  }
 0x152   : > { %1294 = vmatprep.mubr.bf16.mxu1 %v2013_v37  ;;  %1221 = vmatprep.subr.bf16.mxu0 %v1768_v35  ;;  %v1771_v38 = vld [vmem:[#allocation13 + $0x94] ss:$12 sps:$4 sm:$0xff]   ;;  %v1773_v39 = vld [vmem:[#allocation13 + $0x90] ss:$12 sps:$4 sm:$0xff]   ;;  %v1776_v41 = vld [vmem:[#allocation13 + $0x78] ss:$12 sps:$4 sm:$0xff]  }
 0x153   : > { %1222 = vmatpush1.bf16.msra.mxu0 %v1770_v36  ;;  %v1774_v40 = vld [vmem:[#allocation13 + $0x7c] ss:$12 sps:$4 sm:$0xff]   ;;  %v1777_v42 = vld [vmem:[#allocation13 + $0x64] ss:$12 sps:$4 sm:$0xff]   ;;  %v1786_v4 = vld [vmem:[#allocation13 + $0x22c] ss:$12 sps:$4 sm:$0xff]  }
 0x154   : > { %1223 = vmatprep.subr.bf16.mxu0 %v1771_v38  ;;  %v1788_v43 = vld [vmem:[#allocation13 + $0x228] ss:$12 sps:$4 sm:$0xff]   ;;  %v1779_v44 = vld [vmem:[#allocation13 + $0x60] ss:$12 sps:$4 sm:$0xff]   ;;  %1262 = vmatprep.subr.bf16.mxu1 %v1786_v4  ;;  %v1794_v46 = vld [vmem:[#allocation13 + $0x210] ss:$12 sps:$4 sm:$0xff]  }
 0x155   : > { %1263 = vmatpush1.bf16.msra.mxu1 %v1788_v43  ;;  %v1792_v45 = vld [vmem:[#allocation13 + $0x214] ss:$12 sps:$4 sm:$0xff]   ;;  %v1780_v47 = vld [vmem:[#allocation13 + $0x4c] ss:$12 sps:$4 sm:$0xff]   ;;  %v1798_v49 = vld [vmem:[#allocation13 + $0x1fc] ss:$12 sps:$4 sm:$0xff]  }
 0x156   : > { %1264 = vmatprep.subr.bf16.mxu1 %v1792_v45  ;;  %v1782_v48 = vld [vmem:[#allocation13 + $0x48] ss:$12 sps:$4 sm:$0xff]   ;;  %v1800_v51 = vld [vmem:[#allocation13 + $0x1f8] ss:$12 sps:$4 sm:$0xff]   ;;  %v1785_v53 = vld [vmem:[#allocation13 + $0x30] ss:$12 sps:$4 sm:$0xff]  }
 0x157   : > { %1224 = vmatpush1.bf16.msra.mxu0 %v1773_v39  ;;  %v1783_v50 = vld [vmem:[#allocation13 + $0x34] ss:$12 sps:$4 sm:$0xff]   ;;  %v1804_v52 = vld [vmem:[#allocation13 + $0x1e4] ss:$12 sps:$4 sm:$0xff]   ;;  %v1789_v54 = vld [vmem:[#allocation13 + $0x1c] ss:$12 sps:$4 sm:$0xff]  }
 0x158   : > { %1225 = vmatprep.subr.bf16.mxu0 %v1774_v40  ;;  %v1806_v55 = vld [vmem:[#allocation13 + $0x1e0] ss:$12 sps:$4 sm:$0xff]   ;;  %v1791_v57 = vld [vmem:[#allocation13 + $0x18] ss:$12 sps:$4 sm:$0xff]   ;;  %v1812_v59 = vld [vmem:[#allocation13 + $0x1c8] ss:$12 sps:$4 sm:$0xff]  }
 0x159   : > { %1265 = vmatpush1.bf16.msra.mxu1 %v1794_v46  ;;  %v1810_v56 = vld [vmem:[#allocation13 + $0x1cc] ss:$12 sps:$4 sm:$0xff]   ;;  %v1795_v58 = vld [vmem:[#allocation13 + $0x4] ss:$12 sps:$4 sm:$0xff]   ;;  %v1816_v60 = vld [vmem:[#allocation13 + $0x1b4] ss:$12 sps:$4 sm:$0xff]  }
 0x15a   : > { %1266 = vmatprep.subr.bf16.mxu1 %v1798_v49  ;;  %v1797_v61 = vld [vmem:[#allocation13] ss:$12 sps:$4 sm:$0xff]   ;;  %v1818_v63 = vld [vmem:[#allocation13 + $0x1b0] ss:$12 sps:$4 sm:$0xff]   ;;  %v1803_v1 = vld [vmem:[#allocation13 + $0x168] ss:$12 sps:$4 sm:$0xff]  }
 0x15b   : > { %1226 = vmatpush1.bf16.msra.mxu0 %v1776_v41  ;;  %v1801_v62 = vld [vmem:[#allocation13 + $0x16c] ss:$12 sps:$4 sm:$0xff]   ;;  %v1822_v0 = vld [vmem:[#allocation13 + $0x19c] ss:$12 sps:$4 sm:$0xff]   ;;  %v648_v2 = vld [vmem:[#allocation2] sm:$0x7] }
 0x15c   : > { %1227 = vmatprep.subr.bf16.mxu0 %v1777_v42  ;;  %v650_v3 = vld [vmem:[#allocation4] sm:$0x7]  ;;  %v1824_v5 = vld [vmem:[#allocation13 + $0x198] ss:$12 sps:$4 sm:$0xff]   ;;  %v649_v6 = vmul.f32 0.125, %v648_v2  ;;  %vm2152_vm3 = vcmp.lt.s32.totalorder %v661_v12, 384 }
 0x15d   : > { %1267 = vmatpush1.bf16.msra.mxu1 %v1800_v51  ;;  %v652_v7 = vld [vmem:[#allocation3] sm:$0x7]  ;;  %v1807_v8 = vld [vmem:[#allocation13 + $0x154] ss:$12 sps:$4 sm:$0xff]   ;;  %v1828_v9 = vld [vmem:[#allocation13 + $0x184] ss:$12 sps:$4 sm:$0xff]  }
 0x15e   : > { %1268 = vmatprep.subr.bf16.mxu1 %v1804_v52  ;;  %v651_v10 = vsub.f32 %v649_v6, %v650_v3  ;;  %v653_v11 = vmul.f32 0.125, %v652_v7  ;;  %v1809_v13 = vld [vmem:[#allocation13 + $0x150] ss:$12 sps:$4 sm:$0xff]   ;;  %v1830_v16 = vld [vmem:[#allocation13 + $0x180] ss:$12 sps:$4 sm:$0xff]   ;;  %v681_v37 = vshrl.u32 %v661_v12, 7 }
 0x15f   : > { %1228 = vmatpush1.bf16.msra.mxu0 %v1779_v44  ;;  %v1813_v14 = vld [vmem:[#allocation13 + $0x13c] ss:$12 sps:$4 sm:$0xff]   ;;  %v1815_v21 = vld [vmem:[#allocation13 + $0x138] ss:$12 sps:$4 sm:$0xff]   ;;  %v1821_v25 = vld [vmem:[#allocation13 + $0x120] ss:$12 sps:$4 sm:$0xff]  }
 0x160   : > { %1229 = vmatprep.subr.bf16.mxu0 %v1780_v47  ;;  %v654_v17 = vmul.f32 %v651_v10, %v651_v10  ;;  %v1834_v18 = vld [vmem:[#allocation13 + $0x170] ss:$12 sps:$4 sm:$0xff]   ;;  %v1825_v26 = vld [vmem:[#allocation13 + $0x10c] ss:$12 sps:$4 sm:$0xff]   ;;  %v1827_v15 = vld [vmem:[#allocation13 + $0x108] ss:$12 sps:$4 sm:$0xff]  }
 0x161   : > { %1269 = vmatpush1.bf16.msra.mxu1 %v1806_v55  ;;  %v1819_v23 = vld [vmem:[#allocation13 + $0x124] ss:$12 sps:$4 sm:$0xff]   ;;  %v1831_v19 = vld [vmem:[#allocation13 + $0xf4] ss:$12 sps:$4 sm:$0xff]   ;;  %v1836_v28 = vld [vmem:[#allocation13 + $0xdc] ss:$12 sps:$4 sm:$0xff]  }
 0x162   : > { %1270 = vmatprep.subr.bf16.mxu1 %v1810_v56  ;;  %v655_v20 = vsub.f32 %v653_v11, %v654_v17  ;;  %v1833_v27 = vld [vmem:[#allocation13 + $0xf0] ss:$12 sps:$4 sm:$0xff]   ;;  %v657_v30 = vld [vmem:[%s2223_s4] sm:$0x7]  ;;  %v1843_v38 = vld [vmem:[#allocation13 + $0xc0] ss:$12 sps:$4 sm:$0xff]  }
 0x163   : > { %1230 = vmatpush1.bf16.msra.mxu0 %v1782_v48  ;;  %v1838_v31 = vld [vmem:[#allocation13 + $0xd8] ss:$12 sps:$4 sm:$0xff]   ;;  %v674_v40 = vld [vmem:[#allocation7 + $0x8] sm:$0xf]  ;;  %v2166_v42 = vsub.s32 2, %v681_v37  ;;  %v2168_v4 = vsub.s32 1, %v681_v37 }
 0x164   : > { %1231 = vmatprep.subr.bf16.mxu0 %v1783_v50  ;;  %v656_v22 = vmax.f32 %v655_v20, 0.0  ;;  %v1841_v33 = vld [vmem:[#allocation13 + $0xc4] ss:$12 sps:$4 sm:$0xff]   ;;  %v673_v41 = vld [vmem:[#allocation7] sm:$0xff]  ;;  %v2170_v43 = vsub.s32 0, %v681_v37  ;;  %v2014_v44 = vmov 0.0   ;;  %v677_v45 = vunpack.c.l.bf16 %v674_v40 }
 0x165   : > { %1271 = vmatpush1.bf16.msra.mxu1 %v1812_v59  ;;  %v666_v35 = vld [vmem:[%s2224_s5] sm:$0x7]  ;;  %v675_v46 = vunpack.c.l.bf16 %v673_v41  ;;  %v676_v47 = vunpack.c.h.bf16 %v673_v41  ;;  %v1847_v7 = vld [vmem:[#allocation13 + $0x230] ss:$12 sps:$4 sm:$0xff]   ;;  %v1845_v11 = vld [vmem:[#allocation13 + $0x80] ss:$12 sps:$4 sm:$0xff]  }
 0x166   : > { %1272 = vmatprep.subr.bf16.mxu1 %v1816_v60  ;;  %v658_v24 = vadd.f32 1e-05, %v656_v22  ;;  %v1839_v3 = vld [vmem:[#allocation13 + $0x158] ss:$12 sps:$4 sm:$0xff]   ;;  %v1849_v17 = vld [vmem:[#allocation13 + $0x110] ss:$12 sps:$4 sm:$0xff]  }
 0x167   : > { %1232 = vmatpush1.bf16.msra.mxu0 %v1785_v53  ;;  %v1850_v10 = vld [vmem:[#allocation13 + $0x218] ss:$12 sps:$4 sm:$0xff]   ;;  %v1851_v20 = vld [vmem:[#allocation13 + $0x50] ss:$12 sps:$4 sm:$0xff]   ;;  %v1860_v12 = vld [vmem:[#allocation13 + $0x8] ss:$12 sps:$4 sm:$0xff]  }
 0x168   : > { %1233 = vmatprep.subr.bf16.mxu0 %v1789_v54  ;;  %1864 = vrsqrt.f32 %v658_v24  ;;  %v1859_v22 = vld [vmem:[#allocation13 + $0x1d0] ss:$12 sps:$4 sm:$0xff]   ;;  %v1855_v24 = vld [vmem:[#allocation13 + $0xe0] ss:$12 sps:$4 sm:$0xff]  }
 0x169   : > { %1273 = vmatpush1.bf16.msra.mxu1 %v1818_v63 }
 0x16a   : > { %1274 = vmatprep.subr.bf16.mxu1 %v1822_v0 }
 0x16b   : > { %1234 = vmatpush1.bf16.msra.mxu0 %v1791_v57 }
 0x16c   : > { %1235 = vmatprep.subr.bf16.mxu0 %v1795_v58 }
 0x16d   : > { %1275 = vmatpush1.bf16.msra.mxu1 %v1824_v5 }
 0x16e   : > { %1276 = vmatprep.subr.bf16.mxu1 %v1828_v9  ;;  %v1844_v9 = vld [vmem:[#allocation13 + $0x140] ss:$12 sps:$4 sm:$0xff]  }
 0x16f   : > { %1236 = vmatpush1.bf16.msra.mxu0 %v1797_v61 }
 0x170   : > { %1237 = vmatprep.subr.bf16.mxu0 %v1801_v62 }
 0x171   : > { %1277 = vmatpush1.bf16.msra.mxu1 %v1830_v16  ;;  %v1848_v16 = vld [vmem:[#allocation13 + $0x68] ss:$12 sps:$4 sm:$0xff]  }
 0x172   : > { %1623 = vmatprep.subr.bf16.mxu1 %v1834_v18  ;;  %v1856_v18 = vld [vmem:[#allocation13 + $0x1e8] ss:$12 sps:$4 sm:$0xff]  }
 0x173   : > { %1238 = vmatpush2.bf16.msra.mxu0 %v1803_v1  ;;  %v1835_v1 = vld [vmem:[#allocation13 + $0xb0] ss:$12 sps:$4 sm:$0xff]  }
 0x174   : > { %1239 = vmatprep.subr.bf16.mxu0 %v1807_v8  ;;  %v1840_v8 = vld [vmem:[#allocation13 + $0x98] ss:$12 sps:$4 sm:$0xff]  }
 0x175   : > { %v1865_v32 = vpop.eup %1864 }
 0x176   : > { %v660_v34 = vmul.f32 %v1865_v32, %v657_v30 }
 0x177   : > { %1240 = vmatpush2.bf16.msra.mxu0 %v1809_v13  ;;  %v1846_v13 = vld [vmem:[#allocation13 + $0x128] ss:$12 sps:$4 sm:$0xff]  }
 0x178   : > { %1241 = vmatprep.subr.bf16.mxu0 %v1813_v14  ;;  %665 = vst.msk [vmem:[#allocation5] sm:$0x7] %vm2152_vm3, %v660_v34  ;;  %v667_v36 = vmul.f32 %v660_v34, %v649_v6  ;;  %v1853_v14 = vld [vmem:[#allocation13 + $0x200] ss:$12 sps:$4 sm:$0xff]  }
 0x17a   : > { %v668_v39 = vsub.f32 %v666_v35, %v667_v36 }
 0x17b   : > { %1242 = vmatpush2.bf16.msra.mxu0 %v1815_v21  ;;  %v1852_v21 = vld [vmem:[#allocation13 + $0xf8] ss:$12 sps:$4 sm:$0xff]  }
 0x17c   : > { %1243 = vmatprep.subr.bf16.mxu0 %v1819_v23  ;;  %669 = vst.msk [vmem:[#allocation6] sm:$0x7] %vm2152_vm3, %v668_v39  ;;  %v1854_v23 = vld [vmem:[#allocation13 + $0x38] ss:$12 sps:$4 sm:$0xff]  }
 0x17f   : > { %1244 = vmatpush2.bf16.msra.mxu0 %v1821_v25  ;;  %v678_v48 = vld [vmem:[#allocation5] sm:$0x7]  ;;  %v1861_v25 = vld [vmem:[#allocation13 + $0x1b8] ss:$12 sps:$4 sm:$0xff]  }
 0x180   : > { %1245 = vmatprep.subr.bf16.mxu0 %v1825_v26  ;;  %v691_v49 = vrot.slane %v678_v48, %v2166_v42  ;;  %v687_v50 = vrot.slane %v678_v48, %v2168_v4  ;;  %v683_v51 = vrot.slane %v678_v48, %v2170_v43  ;;  %v1857_v26 = vld [vmem:[#allocation13 + $0x20] ss:$12 sps:$4 sm:$0xff]  }
 0x182   : > { %v697_v52 = vmul.f32 %v691_v49, %v677_v45  ;;  %v696_v53 = vmul.f32 %v687_v50, %v676_v47  ;;  %v695_v54 = vmul.f32 %v683_v51, %v675_v46 }
 0x183   : > { %1246 = vmatpush2.bf16.msra.mxu0 %v1827_v15  ;;  %v698_v55 = vld [vmem:[#allocation6] sm:$0x7]  ;;  %v1858_v15 = vld [vmem:[#allocation13 + $0xc8] ss:$12 sps:$4 sm:$0xff]  }
 0x184   : > { %1247 = vmatprep.subr.bf16.mxu0 %v1831_v19  ;;  %v711_v56 = vrot.slane %v698_v55, %v2166_v42  ;;  %v707_v57 = vrot.slane %v698_v55, %v2168_v4  ;;  %v703_v58 = vrot.slane %v698_v55, %v2170_v43  ;;  %v1862_v19 = vld [vmem:[#allocation13 + $0x1a0] ss:$12 sps:$4 sm:$0xff]  }
 0x186   : > { %v717_v59 = vadd.f32 %v711_v56, %v697_v52  ;;  %v716_v60 = vadd.f32 %v707_v57, %v696_v53  ;;  %v715_v61 = vadd.f32 %v703_v58, %v695_v54 }
 0x187   : > { %1248 = vmatpush2.bf16.msra.mxu0 %v1833_v27  ;;  %v1863_v27 = vld [vmem:[#allocation13 + $0x188] ss:$12 sps:$4 sm:$0xff]  }
 0x188   : > { %1249 = vmatprep.subr.bf16.mxu0 %v1836_v28  ;;  %v720_v62 = vmax.f32 %v717_v59, 0.0  ;;  %v719_v63 = vmax.f32 %v716_v60, 0.0  ;;  %v718_v0 = vmax.f32 %v715_v61, 0.0  ;;  %v820_v28 = vld [vmem:[%s2222_s3] sm:$0x7] }
 0x189   : > { %v825_v29 = vrot.slane %v820_v28, %v2170_v43  ;;  %v833_v47 = vrot.slane %v820_v28, %v2166_v42 }
 0x18a   : > { %v723_v2 = vpack.c.bf16 %v720_v62, %v720_v62  ;;  %v722_v5 = vpack.c.bf16 %v719_v63, %v719_v63  ;;  %v721_v6 = vpack.c.bf16 %v718_v0, %v718_v0 }
 0x18b   : > { %1250 = vmatpush2.bf16.msra.mxu0 %v1838_v31  ;;  %v829_v31 = vrot.slane %v820_v28, %v2168_v4 }
 0x18c   : > { %1251 = vmatprep.subr.bf16.mxu0 %v1841_v33  ;;  %1295 = vmatmul.mubr.bf16.vlgmr.msra.gmra.mxu1 %v723_v2 }
 0x18d   : > { %1253 = vmatprep.mubr.bf16.mxu0 %v722_v5  ;;  %1624 = vmatpush3.bf16.msra.mxu1 %v1835_v1 }
 0x18e   : > { %1625 = vmatprep.subr.bf16.mxu1 %v1839_v3  ;;  %1335 = vmatprep.mubr.bf16.mxu1 %v722_v5 }
 0x18f   : > { %1252 = vmatpush2.bf16.msra.mxu0 %v1843_v38 }
 0x190   : > { %1662 = vmatprep.subr.bf16.mxu0 %v2014_v44 }
 0x191   : > { %1626 = vmatpush3.bf16.msra.mxu1 %v1840_v8 }
 0x192   : > { %1254 = vmatmul.mubr.bf16.vlgmr.msra.gmra.mxu0 %v721_v6  ;;  %1627 = vmatprep.subr.bf16.mxu1 %v1844_v9 }
 0x193   : > { %1663 = vmatpush3.bf16.msra.mxu0 %v1847_v7  ;;  %1678 = vmatprep.mubr.msk.bf16.mxu0 %vm2015_vm4, %v2014_v44 }
 0x194   : > { %1664 = vmatprep.subr.bf16.mxu0 %v2014_v44 }
 0x195   : > { %1628 = vmatpush3.bf16.msra.mxu1 %v1845_v11 }
 0x196   : > { %1629 = vmatprep.subr.bf16.mxu1 %v1846_v13 }
 0x197   : > { %1665 = vmatpush3.bf16.msra.mxu0 %v1850_v10 }
 0x198   : > { %1666 = vmatprep.subr.bf16.mxu0 %v2014_v44 }
 0x199   : > { %1630 = vmatpush3.bf16.msra.mxu1 %v1848_v16 }
 0x19a   : > { %1631 = vmatprep.subr.bf16.mxu1 %v1849_v17 }
 0x19b   : > { %1667 = vmatpush3.bf16.msra.mxu0 %v1853_v14 }
 0x19c   : > { %1668 = vmatprep.subr.bf16.mxu0 %v2014_v44 }
 0x19d   : > { %1632 = vmatpush3.bf16.msra.mxu1 %v1851_v20 }
 0x19e   : > { %1633 = vmatprep.subr.bf16.mxu1 %v1852_v21 }
 0x19f   : > { %1669 = vmatpush3.bf16.msra.mxu0 %v1856_v18 }
 0x1a0   : > { %1670 = vmatprep.subr.bf16.mxu0 %v2014_v44 }
 0x1a1   : > { %1634 = vmatpush3.bf16.msra.mxu1 %v1854_v23 }
 0x1a2   : > { %1635 = vmatprep.subr.bf16.mxu1 %v1855_v24 }
 0x1a3   : > { %1671 = vmatpush3.bf16.msra.mxu0 %v1859_v22 }
 0x1a4   : > { %1672 = vmatprep.subr.bf16.mxu0 %v2014_v44 }
 0x1a5   : > { %1636 = vmatpush3.bf16.msra.mxu1 %v1857_v26 }
 0x1a6   : > { %1637 = vmatprep.subr.bf16.mxu1 %v1858_v15 }
 0x1a7   : > { %1673 = vmatpush3.bf16.msra.mxu0 %v1861_v25 }
 0x1a8   : > { %1674 = vmatprep.subr.bf16.mxu0 %v2014_v44 }
 0x1a9   : > { %1638 = vmatpush3.bf16.msra.mxu1 %v1860_v12 }
 0x1ab   : > { %1675 = vmatpush3.bf16.msra.mxu0 %v1862_v19 }
 0x1ac   : > { %1676 = vmatprep.subr.bf16.mxu0 %v2014_v44  ;;  %1336 = vmatmul.mubr.bf16.vlgmr.msra.gmra.mxu1 %v721_v6 }
 0x1af   : > { %1677 = vmatpush3.bf16.msra.mxu0 %v1863_v27 }
 0x1b2   : > { %1679 = vmatmul.mubr.bf16.vlgmr.msra.gmra.mxu0 %v723_v2 }
 0x24c   : > { %v1296_v30 = vpop.f32.mrf.mxu1 }
 0x24e   : > { %v1298_v33 = vpop.f32.mrf.mxu1 }
 0x250   : > { %v1300_v36 = vpop.f32.mrf.mxu1 }
 0x252   : > { %v1255_v32 = vpop.f32.mrf.mxu0  ;;  %v1301_v39 = vpop.f32.mrf.mxu1 }
 0x253   : > { %v1256_v34 = vadd.f32 %v1255_v32, %v825_v29 }
 0x254   : > { %v1257_v35 = vpop.f32.mrf.mxu0 }
 0x255   : > { %v1258_v37 = vadd.f32 %v1257_v35, %v829_v31  ;;  %v1297_v40 = vadd.f32 %v1296_v30, %v1256_v34 }
 0x256   : > { %v1259_v38 = vpop.f32.mrf.mxu0 }
 0x257   : > { %v1299_v41 = vadd.f32 %v1298_v33, %v1258_v37 }
 0x258   : > { %v1260_v44 = vpop.f32.mrf.mxu0 }
 0x259   : > { %v1618_v45 = vpack.c.bf16 %v1299_v41, %v1297_v40 }
 0x25b   : > { %1396 = vst [vmem:[#allocation14] sm:$0xff] %v1618_v45 }
 0x26c   : > { %v1639_v46 = vpop.f32.mrf.mxu1 }
 0x26e   : > { %v1640_v48 = vpop.f32.mrf.mxu1 }
 0x26f   : > { %v1641_v49 = vadd.f32 %v1640_v48, %v1639_v46 }
 0x270   : > { %v1642_v50 = vpop.f32.mrf.mxu1 }
 0x271   : > { %v1338_v51 = vadd.f32 %v1641_v49, %v833_v47 }
 0x272   : > { %v1377_v43 = vpop.f32.mrf.mxu0  ;;  %v1643_v53 = vpop.f32.mrf.mxu1 }
 0x273   : > { %v1378_v54 = vadd.f32 %v1377_v43, %v1338_v51 }
 0x274   : > { %v1680_v4 = vpop.f32.mrf.mxu0 }
 0x275   : > { %v1619_v56 = vpack.c.bf16 %v1378_v54, %v1378_v54 }
 0x276   : > { %v1380_v52 = vpop.f32.mrf.mxu0 }
 0x277   : > { %1397 = vst [vmem:[#allocation14 + $0x8] sm:$0xf] %v1619_v56 }
 0x278   : > { %v1681_v55 = vpop.f32.mrf.mxu0 }
 0x279 PF: > { %p2195_p4 = scmp.eq.s32.totalorder %s1515_s24, 1  ;;  %s2016_s13 = smov [#allocation14]  }
 0x27a   : > { %s1414_s14 = sshll.u32 %s2016_s13, 4  ;;  %s1415_s14 = int_to_ptr.vmem [resolvable:$true] %s1414_s14 }
 0x27b   : > { %s1944_s15 = scalar_lea.vmem %s1415_s14, 192  ;;  %s1950_s16 = scalar_lea.vmem %s1415_s14, 384 }
 0x27c   : > { %p1945_p6 = scmp.ne.s32.totalorder %s1415_s14, %s1944_s15  ;;  %p1951_p9 = scmp.lt.s32.totalorder %s1415_s14, %s1415_s14 }
 0x27d   : > { %p1952_p10 = scmp.lt.s32.totalorder %s1950_s16, %s1944_s15 }
 0x27e   : > { %p1946_p5 = pnand %p1945_p6, %p2195_p4 }
 0x27f   : > { %p1953_p11 = por %p1952_p10, %p1951_p9 }
 0x280   : > { %p1947_p2 = pneg %p1946_p5 }
 0x282   : > { %p1954_p13 = pnand %p1953_p11, %p1947_p2 }
 0x284   : > { %1957 = shalt.err (!%p1954_p13)
}
 0x285   : > { %1695 = dma.vmem_to_hbm [thread:$0]  (%p2195_p4), %s1415_s14, 192, %s2225_s6, [#allocation10]  }
 0x286 PF: > { %p1722_p12 = scmp.eq.s32.totalorder %s1516_s25, 1  ;;  %p2235_p0 = scmp.ge.s32.totalorder %s2002_s23, 2 }
 0x288   : > { %p1710_p1 = pnand %p1722_p12, %p2235_p0 }
 0x28a   : > { %p1711_p7 = pneg %p1710_p1 }
 0x28c   : > { %1989 = dma.done.wait (%p1711_p7), [#allocation10], 192  }
 0x28d   : > { %1991 = vsyncadd (%p1711_p7), [#allocation10], 4294967104  ;;  %s23_s23 = sadd.s32 1, %s2002_s23   ;;  %s2236_s21 = smov %s1998_s22 }
 0x28e   : > { %p20_p8 = scmp.ge.s32.totalorder %s23_s23, 4   ;;  %s2237_s22 = smov %s2239_s26 }
 0x290   :  { %22 = sbr.rel (!%p20_p8) target bundleno = 6 (0x6), region = 119 }
 0x295   :  { %1432 = vsyncpa [#allocation9], 1 }
 0x296   :  { %1434 = vsyncpa [#allocation9 + $0x1], 1 }
 0x297   :  { %1435 = vsyncpa [#allocation12], 1 }
 0x298   :  { %1436 = vsyncpa [#allocation10], 1 }
 0x299   :  { %1438 = vsyncpa [#allocation10 + $0x1], 1 }

</bundles_post_ra>
